<compile_context>
chip_gen: v6e
topology: v6e:2x2x1
jax: 0.10.0
libtpu: 0.0.40
codegen_flags: <defaults>
</compile_context>

<pallas_src>
import jax
import jax.numpy as jnp
from jax.experimental import pallas as pl
from jax.experimental.pallas import tpu as pltpu


def _round_up(x, m):
    return ((x + m - 1) // m) * m


def _ssc_linear_kernel(x_ref, w_ref, b_ref, o_ref):
    # x_ref: (TILE_B, H_pad) f32  (native activation dtype; no wrapper cast)
    # w_ref: (H_pad, C_pad)  f32  (grid-invariant, VMEM-resident)
    # b_ref: (1, C_pad)      f32
    # o_ref: (TILE_B, C_pad) bf16 (lane-dense store; halved HBM writeback)
    # Dropout in eval mode is identity, so the hot path is matmul + bias.
    # TODO(synk): training-mode dropout (pltpu.prng_seed / prng_random_bits mask)
    # not emitted; eval semantics only.
    acc = jnp.dot(x_ref[...], w_ref[...], preferred_element_type=jnp.float32)
    o_ref[...] = (acc + b_ref[...]).astype(o_ref.dtype)


def ssc_module_forward(x, w_t, b, *, tile_b=2048, store_dtype=jnp.bfloat16):
    """SSCModule forward (eval mode): y = dropout(x) @ W^T + b == x @ W^T + b.

    x:   (B, H) float32 activations
    w_t: (H, C) float32 -- Linear weight, already transposed once at load time
    b:   (C,)   float32
    """
    B, H = x.shape
    H2, C = w_t.shape
    assert H == H2, (H, H2)
    assert b.shape == (C,)

    out_dtype = x.dtype

    # ---- lane/MXU-friendly padded extents ------------------------------------
    # Keep the output exactly 128 lanes wide (minimum lane-dense store).
    c_pad = _round_up(max(C, 128), 128)
    # Pad the K dim only when it is not already a multiple of 128 (BERT hidden
    # sizes 768/1024 take the zero-copy path for x).
    h_pad = H if H % 128 == 0 else _round_up(H, 128)

    # ---- batch tiling ---------------------------------------------------------
    tile_b = int(tile_b)
    if B <= 16:
        tile_b = _round_up(max(B, 8), 8)          # one tiny tile
    else:
        # Ensure >= 2 grid steps so the "parallel" batch axis can split across
        # both v7x TensorCores (neutral on single-TC v5e/v6e).
        tile_b = max(8, min(tile_b, _round_up(pl.cdiv(B, 2), 8)))

    x_itemsize = jnp.dtype(x.dtype).itemsize
    w_itemsize = jnp.dtype(w_t.dtype).itemsize
    s_itemsize = jnp.dtype(store_dtype).itemsize

    # ---- VMEM budget (no double-counting) and generation-aware cap ------------
    def _vmem_needed(tb):
        return (
            2 * tb * h_pad * x_itemsize        # x stream (double-buffered)
            + 2 * h_pad * c_pad * w_itemsize   # W (grid-invariant; 2 bufs worst case)
            + 2 * c_pad * 4                    # bias
            + 2 * tb * c_pad * s_itemsize      # output stream (double-buffered)
        )

    try:
        vmem_cap = int(pltpu.get_tpu_info().vmem_capacity_bytes)
    except Exception:  # pragma: no cover - conservative fallback (v7x per-TC)
        vmem_cap = 64 << 20
    vmem_budget_cap = min(vmem_cap * 3 // 4, vmem_cap - (8 << 20))

    # Shrink tile_b until the double-buffered blocks fit the per-TC budget.
    while tile_b > 8 and _vmem_needed(tile_b) > vmem_budget_cap:
        tile_b = max(8, _round_up(tile_b // 2, 8))

    num_tiles = pl.cdiv(B, tile_b)
    vmem_limit = int(max(min(_vmem_needed(tile_b) + (2 << 20), vmem_budget_cap), 4 << 20))

    # ---- inputs (x is only copied if H needs zero-padding) --------------------
    if h_pad != H:
        x_in = jnp.pad(x, ((0, 0), (0, h_pad - H)))
        w_in = jnp.pad(w_t, ((0, h_pad - H), (0, c_pad - C))).astype(jnp.float32)
    else:
        x_in = x
        w_in = jnp.pad(w_t, ((0, 0), (0, c_pad - C))).astype(jnp.float32)
    b_in = jnp.pad(b, (0, c_pad - C)).astype(jnp.float32).reshape(1, c_pad)

    # Output rows rounded to the sublane multiple so HBM writeback stays
    # unmasked; Pallas masks the ragged trailing batch block automatically.
    b_out = _round_up(max(B, 8), 8)

    out_padded = pl.pallas_call(
        _ssc_linear_kernel,
        out_shape=jax.ShapeDtypeStruct((b_out, c_pad), store_dtype),
        grid_spec=pl.GridSpec(
            grid=(num_tiles,),
            in_specs=[
                pl.BlockSpec((tile_b, h_pad), lambda i: (i, 0)),   # x stream
                pl.BlockSpec((h_pad, c_pad), lambda i: (0, 0)),    # W resident
                pl.BlockSpec((1, c_pad), lambda i: (0, 0)),        # bias resident
            ],
            out_specs=pl.BlockSpec((tile_b, c_pad), lambda i: (i, 0)),
        ),
        compiler_params=pltpu.CompilerParams(
            dimension_semantics=("parallel",),   # batch axis -> megacore on v7x
            vmem_limit_bytes=vmem_limit,
        ),
    )(x_in, w_in, b_in)

    # Slice off padding outside the kernel (keeps the in-kernel store lane-dense)
    # and widen the bf16 logits back to the activation dtype.
    return out_padded[:B, :C].astype(out_dtype)


if __name__ == "__main__":
    hidden_size = 32
    output_classes = 2
    batch = 8

    key = jax.random.PRNGKey(0)
    kx, kw, kb = jax.random.split(key, 3)

    # Deterministic synthetic parameters (nn.Linear: weight (C, H), bias (C,))
    weight = jax.random.normal(kw, (output_classes, hidden_size), jnp.float32) * 0.02
    bias = jax.random.normal(kb, (output_classes,), jnp.float32) * 0.02
    x = jax.random.normal(kx, (batch, hidden_size), jnp.float32)

    # Pre-transpose the weight ONCE (load-time).
    w_t = jnp.asarray(weight.T)

    out = ssc_module_forward(x, w_t, bias)
    out = jax.block_until_ready(out)

    # Reference (eval-mode dropout = identity). Matmul + bias are full f32 in
    # the kernel; only the final store rounds to bf16, so tolerance is tight.
    ref = x @ weight.T + bias
    assert out.shape == (batch, output_classes), out.shape
    assert out.dtype == x.dtype
    assert jnp.allclose(out, ref, atol=1e-2, rtol=1e-2), float(jnp.max(jnp.abs(out - ref)))

    print("KERNEL_OK")
</pallas_src>

<mosaic_0001>
module attributes {stable_mosaic.version = 11 : i64} {
  func.func @_ssc_linear_kernel(%arg0: i32, %arg1: memref<8x128xf32, #tpu.memory_space<vmem>>, %arg2: memref<128x128xf32, #tpu.memory_space<vmem>>, %arg3: memref<1x128xf32, #tpu.memory_space<vmem>>, %arg4: memref<8x128xbf16, #tpu.memory_space<vmem>>) attributes {dimension_semantics = [#tpu.dimension_semantics<parallel>], iteration_bounds = array<i64: 1>, scalar_prefetch = 0 : i64, scratch_operands = 0 : i64, tpu.core_type = #tpu.core_type<tc>, window_params = [{transform_indices = @transform_0, window_bounds = array<i64: 8, 128>}, {pipeline_mode = #tpu.pipeline_mode<synchronous>, transform_indices = @transform_1, window_bounds = array<i64: 128, 128>}, {pipeline_mode = #tpu.pipeline_mode<synchronous>, transform_indices = @transform_2, window_bounds = array<i64: 1, 128>}, {transform_indices = @transform_3, window_bounds = array<i64: 8, 128>}]} {
    %c0 = arith.constant 0 : index
    %c0_0 = arith.constant 0 : index
    %0 = vector.load %arg1[%c0, %c0_0] : memref<8x128xf32, #tpu.memory_space<vmem>>, vector<8x128xf32>
    %c0_1 = arith.constant 0 : index
    %c0_2 = arith.constant 0 : index
    %1 = vector.load %arg2[%c0_1, %c0_2] : memref<128x128xf32, #tpu.memory_space<vmem>>, vector<128x128xf32>
    %cst = arith.constant dense<0.000000e+00> : vector<8x128xf32>
    %2 = tpu.matmul %0, %1, %cst {dimension_numbers = #tpu.dot_dimension_numbers<[1], [0], [0], [1], [0, 0, 1, 1], [], []>} : vector<8x128xf32>, vector<128x128xf32>, vector<8x128xf32> -> vector<8x128xf32>
    %c0_3 = arith.constant 0 : index
    %c0_4 = arith.constant 0 : index
    %3 = vector.load %arg3[%c0_3, %c0_4] : memref<1x128xf32, #tpu.memory_space<vmem>>, vector<1x128xf32>
    %4 = vector.broadcast %3 : vector<1x128xf32> to vector<8x128xf32>
    %5 = arith.addf %2, %4 : vector<8x128xf32>
    %6 = arith.truncf %5 : vector<8x128xf32> to vector<8x128xbf16>
    %c0_5 = arith.constant 0 : index
    %c0_6 = arith.constant 0 : index
    %7 = vector.load %arg4[%c0_5, %c0_6] : memref<8x128xbf16, #tpu.memory_space<vmem>>, vector<8x128xbf16>
    tpu.vector_store %arg4[%c0_5, %c0_6], %6 {strides = array<i32>} : memref<8x128xbf16, #tpu.memory_space<vmem>>, vector<8x128xbf16>,
    return
  }
  func.func @transform_0(%arg0: i32) -> (i32, i32) {
    %c0_i32 = arith.constant 0 : i32
    %c0_i32_0 = arith.constant 0 : i32
    return %arg0, %c0_i32 : i32, i32
  }
  func.func @transform_1(%arg0: i32) -> (i32, i32) {
    %c0_i32 = arith.constant 0 : i32
    %c0_i32_0 = arith.constant 0 : i32
    %c0_i32_1 = arith.constant 0 : i32
    return %c0_i32, %c0_i32_0 : i32, i32
  }
  func.func @transform_2(%arg0: i32) -> (i32, i32) {
    %c0_i32 = arith.constant 0 : i32
    %c0_i32_0 = arith.constant 0 : i32
    %c0_i32_1 = arith.constant 0 : i32
    return %c0_i32, %c0_i32_0 : i32, i32
  }
  func.func @transform_3(%arg0: i32) -> (i32, i32) {
    %c0_i32 = arith.constant 0 : i32
    %c0_i32_0 = arith.constant 0 : i32
    return %arg0, %c0_i32 : i32, i32
  }
}

</mosaic_0001>

<bundles_post_ra>
// kernel: tpu_custom_call.1
= control target key start
LH: loop header
LB: loop body
LE: loop exit
PB: predicated region body
PF: predicated region fallthrough
CT: control target
= control target key end

     0   :  { %8 = vsyncpa [#allocation3], 0  ;;  %s318_s0 = inlined_call_operand.hbm [shape: f32[8,128], index: 0, kind: input, shape index: {}]   ;;  %s319_s1 = inlined_call_operand.hbm [shape: f32[128,128], index: 1, kind: input, shape index: {}]   ;;  %s320_s2 = inlined_call_operand.vmem [shape: f32[1,128], index: 2, kind: input, shape index: {}]   ;;  %s321_s3 = inlined_call_operand.hbm [shape: bf16[8,128], index: 3, kind: output, shape index: {}]  }
   0x1   :  { %9 = vsyncpa [#allocation6], 0 }
   0x2   :  { %10 = vsyncpa [#allocation4], 0  ;;  %s279_s12 = smov [#allocation2]   ;;  %s280_s14 = smov [#allocation5]  }
   0x3   :  { %s17_s13 = sshll.u32 %s279_s12, 4  ;;  %s26_s15 = sshll.u32 %s280_s14, 4  ;;  %s18_s13 = int_to_ptr.vmem [resolvable:$true] %s17_s13  ;;  %s27_s15 = int_to_ptr.vmem [resolvable:$true] %s26_s15 }
   0x4   :  { %s221_s16 = scalar_lea.vmem %s18_s13, 128  ;;  %p226_p1 = scmp.lt.s32.totalorder %s18_s13, %s18_s13 }
   0x5   :  { %p222_p0 = scmp.ne.s32.totalorder %s18_s13, %s221_s16  ;;  %p227_p2 = scmp.lt.s32.totalorder %s221_s16, %s221_s16 }
   0x7   :  { %p228_p3 = por %p227_p2, %p226_p1 }
   0x9   :  { %p229_p4 = pnand %p228_p3, %p222_p0 }
   0xb   :  { %232 = shalt.err (!%p229_p4)
}
   0xc   :  { %20 = dma.hbm_to_vmem [thread:$0]  %s318_s0, 128, %s18_s13, [#allocation3]  }
   0xd   :  { %s241_s19 = scalar_lea.vmem %s27_s15, 2048  ;;  %p246_p6 = scmp.lt.s32.totalorder %s27_s15, %s27_s15 }
   0xe   :  { %p242_p5 = scmp.ne.s32.totalorder %s27_s15, %s241_s19  ;;  %p247_p7 = scmp.lt.s32.totalorder %s241_s19, %s241_s19 }
  0x10   :  { %p248_p8 = por %p247_p7, %p246_p6 }
  0x12   :  { %p249_p9 = pnand %p248_p8, %p242_p5 }
  0x14   :  { %252 = shalt.err (!%p249_p9)
}
  0x15   :  { %s281_s20 = smov 128   ;;  %s282_s21 = smov 8  }
  0x16   :  { %32 = dma.hbm_to_vmem [thread:$0]  %s319_s1, 2048, %s27_s15, [#allocation6], %s281_s20, %s281_s20, %s282_s21  }
  0x17   :  { %273 = dma.done.wait [#allocation3], 128  }
  0x18   :  { %274 = vsyncadd [#allocation3], 4294967168 }
  0x19   :  { %275 = dma.done.wait [#allocation6], 2048  }
  0x1a   :  { %276 = vsyncadd [#allocation6], 4294965248  ;;  %v283_v0 = vmov 0.0   ;;  %vm284_vm0 = vmmov 0   ;;  %v57_v1 = vld [vmem:[#allocation5 + $0x78] sm:$0xff]  ;;  %v56_v2 = vld [vmem:[#allocation5 + $0x70] sm:$0xff] }
  0x1b   :  { %171 = vmatprep.subr.mxu0 %v283_v0  ;;  %203 = vmatprep.mubr.msk.f32.mxu0 %vm284_vm0, %v283_v0  ;;  %v55_v3 = vld [vmem:[#allocation5 + $0x68] sm:$0xff]  ;;  %v54_v4 = vld [vmem:[#allocation5 + $0x60] sm:$0xff]  ;;  %v53_v5 = vld [vmem:[#allocation5 + $0x58] sm:$0xff]  ;;  %s285_s24 = smov [#allocation7]  }
  0x1c   :  { %172 = vmatpush3.msra.mxu0 %v57_v1  ;;  %v52_v6 = vld [vmem:[#allocation5 + $0x50] sm:$0xff]  ;;  %v51_v7 = vld [vmem:[#allocation5 + $0x48] sm:$0xff]  ;;  %v50_v8 = vld [vmem:[#allocation5 + $0x40] sm:$0xff]  ;;  %s143_s25 = sshll.u32 %s285_s24, 4  ;;  %s144_s25 = int_to_ptr.vmem [resolvable:$true] %s143_s25 }
  0x1d   :  { %173 = vmatprep.subr.mxu0 %v283_v0  ;;  %v49_v9 = vld [vmem:[#allocation5 + $0x38] sm:$0xff]  ;;  %v48_v10 = vld [vmem:[#allocation5 + $0x30] sm:$0xff]  ;;  %v47_v11 = vld [vmem:[#allocation5 + $0x28] sm:$0xff]  ;;  %s253_s26 = scalar_lea.vmem %s144_s25, 64  ;;  %p258_p11 = scmp.lt.s32.totalorder %s144_s25, %s144_s25 }
  0x1e   :  { %174 = vmatpush3.msra.mxu0 %v56_v2  ;;  %v46_v12 = vld [vmem:[#allocation5 + $0x20] sm:$0xff]  ;;  %v45_v13 = vld [vmem:[#allocation5 + $0x18] sm:$0xff]  ;;  %v44_v14 = vld [vmem:[#allocation5 + $0x10] sm:$0xff]  ;;  %p254_p10 = scmp.ne.s32.totalorder %s144_s25, %s253_s26  ;;  %p259_p12 = scmp.lt.s32.totalorder %s253_s26, %s253_s26 }
  0x1f   :  { %175 = vmatprep.subr.mxu0 %v283_v0  ;;  %v43_v15 = vld [vmem:[#allocation5 + $0x8] sm:$0xff]  ;;  %v42_v16 = vld [vmem:[#allocation5] sm:$0xff]  ;;  %v41_v17 = vld [vmem:[#allocation2] sm:$0xff] }
  0x20   :  { %176 = vmatpush3.msra.mxu0 %v55_v3  ;;  %v153_v18 = vld [vmem:[%s320_s2] ss:$0 sm:$0xff]  ;;  %p260_p13 = por %p259_p12, %p258_p11 }
  0x21   :  { %177 = vmatprep.subr.mxu0 %v283_v0 }
  0x22   :  { %178 = vmatpush3.msra.mxu0 %v54_v4  ;;  %p261_p0 = pnand %p260_p13, %p254_p10 }
  0x23   :  { %179 = vmatprep.subr.mxu0 %v283_v0 }
  0x24   :  { %180 = vmatpush3.msra.mxu0 %v53_v5 }
  0x25   :  { %181 = vmatprep.subr.mxu0 %v283_v0 }
  0x26   :  { %182 = vmatpush3.msra.mxu0 %v52_v6 }
  0x27   :  { %183 = vmatprep.subr.mxu0 %v283_v0 }
  0x28   :  { %184 = vmatpush3.msra.mxu0 %v51_v7 }
  0x29   :  { %185 = vmatprep.subr.mxu0 %v283_v0 }
  0x2a   :  { %186 = vmatpush3.msra.mxu0 %v50_v8 }
  0x2b   :  { %187 = vmatprep.subr.mxu0 %v283_v0 }
  0x2c   :  { %188 = vmatpush3.msra.mxu0 %v49_v9 }
  0x2d   :  { %189 = vmatprep.subr.mxu0 %v283_v0 }
  0x2e   :  { %190 = vmatpush3.msra.mxu0 %v48_v10 }
  0x2f   :  { %191 = vmatprep.subr.mxu0 %v283_v0 }
  0x30   :  { %192 = vmatpush3.msra.mxu0 %v47_v11 }
  0x31   :  { %193 = vmatprep.subr.mxu0 %v283_v0 }
  0x32   :  { %194 = vmatpush3.msra.mxu0 %v46_v12 }
  0x33   :  { %195 = vmatprep.subr.mxu0 %v283_v0 }
  0x34   :  { %196 = vmatpush3.msra.mxu0 %v45_v13 }
  0x35   :  { %197 = vmatprep.subr.mxu0 %v283_v0 }
  0x36   :  { %198 = vmatpush3.msra.mxu0 %v44_v14 }
  0x37   :  { %199 = vmatprep.subr.mxu0 %v283_v0 }
  0x38   :  { %200 = vmatpush3.msra.mxu0 %v43_v15 }
  0x39   :  { %201 = vmatprep.subr.mxu0 %v283_v0 }
  0x3a   :  { %202 = vmatpush3.msra.mxu0 %v42_v16 }
  0x3b   :  { %204 = vmatmul.mubr.f32.vlgmr.msra.gmra.mxu0 %v41_v17 }
  0xfb   :  { %v131_v19 = vpop.f32.mrf.mxu0 }
  0xfc   :  { %v132_v20 = vadd.f32 %v153_v18, %v131_v19 }
  0xfd   :  { %v205_v21 = vpop.f32.mrf.mxu0 }
  0xfe   :  { %v135_v22 = vpack.c.bf16 %v132_v20, %v132_v20 }
 0x100   :  { %136 = vst [vmem:[#allocation7] sm:$0xf] %v135_v22 }
 0x101   :  { %264 = shalt.err (!%p261_p0)
}
 0x102   :  { %146 = dma.vmem_to_hbm [thread:$0]  %s144_s25, 64, %s321_s3, [#allocation4]  }
 0x103   :  { %277 = dma.done.wait [#allocation4], 64  }
 0x104   :  { %278 = vsyncadd [#allocation4], 4294967232 }
 0x105   :  { %150 = vsyncpa [#allocation3], 1 }
 0x106   :  { %151 = vsyncpa [#allocation6], 1 }
 0x107   :  { %152 = vsyncpa [#allocation4], 1 }

</bundles_post_ra>
